<compile_context>
chip_gen: v7x
topology: tpu7x:2x2x1
jax: 0.10.0
libtpu: 0.0.40
codegen_flags: <defaults>
</compile_context>

<pallas_src>
import math

import jax
import jax.numpy as jnp
from jax.experimental import pallas as pl
from jax.experimental.pallas import tpu as pltpu


def _round_up(x, m):
    return ((x + m - 1) // m) * m


def _pad2d(a, rows, cols, dtype):
    """Cast to dtype and zero-pad to (rows, cols); no copy if already there."""
    a = a.astype(dtype)
    if a.shape == (rows, cols):
        return a
    return jnp.zeros((rows, cols), dtype).at[: a.shape[0], : a.shape[1]].set(a)


def _vmem_budget_bytes():
    """Per-TensorCore VMEM budget: 80% of physical capacity (headroom for
    compiler scratch).  ~51 MiB on v7x, ~102 MiB on v5e/v6e."""
    cap = 64 * 1024 * 1024
    try:
        cap = int(getattr(pltpu.get_tpu_info(), "vmem_capacity_bytes", cap))
    except Exception:  # no TPU info available -> conservative default
        pass
    return int(cap * 0.8)


def _est_vmem_bytes(tile_n, dim_p, tile_h, out_p, weights_resident):
    """VMEM plan for one candidate hidden-slab size."""
    wbuf = 1 if weights_resident else 2     # Buffered(1) when index is constant
    return (2 * tile_n * dim_p * 2          # x tile (bf16, double buffered)
            + wbuf * dim_p * tile_h * 2     # W1 slab (bf16)
            + wbuf * tile_h * 4             # b1 slab (f32)
            + wbuf * tile_h * out_p * 2     # W2 slab (bf16)
            + out_p * 4                     # b2 (f32, grid constant)
            + 2 * tile_n * out_p * 2        # out tile (bf16, double buffered)
            + tile_n * out_p * 4            # f32 accumulator scratch
            + tile_n * tile_h * 4)          # f32 hidden intermediate


def _choose_tile_n(n, target):
    """Largest multiple of 16 <= target that divides the 16-padded batch (so no
    grid step is pure zero padding); prefer >= 2 steps for v7x megacore."""
    n_pad = _round_up(max(n, 1), 16)
    target = max(16, min(_round_up(target, 16), n_pad))
    cands = [t for t in range(16, target + 1, 16) if n_pad % t == 0]
    tile = cands[-1]
    if n_pad // tile < 2:
        two_step = [t for t in cands if n_pad // t >= 2]
        if two_step:
            tile = two_step[-1]
    return tile, n_pad


def _choose_tile_h(dim_p, hid_p, out_p, tile_n, budget, max_tile_h=None):
    """Largest hidden slab (multiple of 128 dividing hid_p) whose VMEM plan
    fits the budget.  tile_h == hid_p means fully-resident weights."""
    cands = [t for t in range(128, hid_p + 1, 128) if hid_p % t == 0]
    if max_tile_h is not None:
        cands = [t for t in cands if t <= max_tile_h] or cands[:1]
    for t in reversed(cands):
        if _est_vmem_bytes(tile_n, dim_p, t, out_p, t == hid_p) <= budget:
            return t
    # TODO(synk): for extreme dim/out_dim also tile the input/output feature
    # axes so even tile_h=128 fits; here we fall through and let Mosaic cope.
    return cands[0]


def _resident_spec(shape, index_map):
    """BlockSpec for a block whose index never changes over the grid: single
    buffer it (double-buffering constant data only wastes VMEM)."""
    try:
        return pl.BlockSpec(shape, index_map, pipeline_mode=pl.Buffered(1))
    except TypeError:  # jax without pipeline_mode support: default buffering
        return pl.BlockSpec(shape, index_map)


def feed_forward_kernel(x_ref, w1_ref, b1_ref, w2_ref, b2_ref, o_ref, acc_ref):
    kh = pl.program_id(1)

    @pl.when(kh == 0)
    def _init():
        acc_ref[...] = jnp.zeros_like(acc_ref)

    # GEMM1 over the full `dim` against one hidden slab; bias + ReLU in f32 on
    # the VPU; cast back to bf16 for the second MXU pass.
    h = jnp.dot(x_ref[...], w1_ref[...], preferred_element_type=jnp.float32)
    h = jnp.maximum(h + b1_ref[...], 0.0)
    acc_ref[...] += jnp.dot(h.astype(jnp.bfloat16), w2_ref[...],
                            preferred_element_type=jnp.float32)

    @pl.when(kh == pl.num_programs(1) - 1)
    def _store():
        o_ref[...] = (acc_ref[...] + b2_ref[...]).astype(o_ref.dtype)


def prepare_feed_forward_params(w1, b1, w2, b2):
    """Pad feature dims to multiples of 128 and cast weights to bf16 ONCE
    (call at init; reuse across feed_forward calls).

    w1: (dim, hidden), b1: (hidden,), w2: (hidden, out_dim), b2: (out_dim,)
    i.e. weights stored as (in_features, out_features) == torch weight.T.
    """
    dim, hidden = w1.shape
    out_dim = w2.shape[1]
    dim_p = _round_up(dim, 128)
    hid_p = _round_up(hidden, 128)
    out_p = _round_up(out_dim, 128)
    return dict(
        w1=_pad2d(w1, dim_p, hid_p, jnp.bfloat16),
        b1=_pad2d(b1.reshape(1, -1), 1, hid_p, jnp.float32),
        w2=_pad2d(w2, hid_p, out_p, jnp.bfloat16),
        b2=_pad2d(b2.reshape(1, -1), 1, out_p, jnp.float32),
        dim=dim, hidden=hidden, out_dim=out_dim,
    )


def feed_forward(x, params, *, tile_n=256, out_dtype=jnp.bfloat16,
                 max_tile_h=None):
    """relu(x @ w1 + b1) @ w2 + b2 using prepared params.  Returns
    (N, out_dim) in out_dtype."""
    n, dim = x.shape
    assert dim == params["dim"], (dim, params["dim"])
    w1, b1, w2, b2 = params["w1"], params["b1"], params["w2"], params["b2"]
    out_dim = params["out_dim"]
    dim_p, hid_p = w1.shape
    out_p = w2.shape[1]

    tile_n, n_p = _choose_tile_n(n, tile_n)
    budget = _vmem_budget_bytes()
    tile_h = _choose_tile_h(dim_p, hid_p, out_p, tile_n, budget, max_tile_h)
    num_kh = hid_p // tile_h
    weights_resident = num_kh == 1

    xp = _pad2d(x, n_p, dim_p, jnp.bfloat16)   # only copies if padding needed

    w_spec = _resident_spec if weights_resident else pl.BlockSpec
    in_specs = [
        pl.BlockSpec((tile_n, dim_p), lambda i, k: (i, 0)),      # x tile
        w_spec((dim_p, tile_h), lambda i, k: (0, k)),            # W1 slab
        w_spec((1, tile_h), lambda i, k: (0, k)),                # b1 slab
        w_spec((tile_h, out_p), lambda i, k: (k, 0)),            # W2 slab
        _resident_spec((1, out_p), lambda i, k: (0, 0)),         # b2 (constant)
    ]
    out_spec = pl.BlockSpec((tile_n, out_p), lambda i, k: (i, 0))

    num_batch_tiles = n_p // tile_n
    weight_bytes = (w1.size * w1.dtype.itemsize + w2.size * w2.dtype.itemsize
                    + b1.size * 4 + b2.size * 4)
    cost = pl.CostEstimate(
        flops=2 * n_p * (dim_p * hid_p + hid_p * out_p),
        transcendentals=0,
        bytes_accessed=(xp.size * 2
                        + (1 if weights_resident else num_batch_tiles)
                        * weight_bytes
                        + n_p * out_p * jnp.dtype(out_dtype).itemsize),
    )

    out = pl.pallas_call(
        feed_forward_kernel,
        out_shape=jax.ShapeDtypeStruct((n_p, out_p), out_dtype),
        grid_spec=pltpu.PrefetchScalarGridSpec(
            num_scalar_prefetch=0,
            grid=(num_batch_tiles, num_kh),
            in_specs=in_specs,
            out_specs=out_spec,
            scratch_shapes=[pltpu.VMEM((tile_n, out_p), jnp.float32)],
        ),
        compiler_params=pltpu.CompilerParams(
            dimension_semantics=("parallel", "arbitrary"),
            vmem_limit_bytes=budget,
        ),
        cost_estimate=cost,
    )(xp, w1, b1, w2, b2)

    return out[:n, :out_dim]


def init_feed_forward_params(key, dim, hidden_dim):
    """torch.nn.Linear default init: U(-1/sqrt(fan_in), 1/sqrt(fan_in)) for
    weight and bias; weights built pre-transposed (in, out)."""
    k1, k2, k3, k4 = jax.random.split(key, 4)
    bound1 = 1.0 / math.sqrt(dim)
    w1 = jax.random.uniform(k1, (dim, hidden_dim), jnp.float32, -bound1, bound1)
    b1 = jax.random.uniform(k2, (hidden_dim,), jnp.float32, -bound1, bound1)
    bound2 = 1.0 / math.sqrt(hidden_dim)
    w2 = jax.random.uniform(k3, (hidden_dim, dim), jnp.float32, -bound2, bound2)
    b2 = jax.random.uniform(k4, (dim,), jnp.float32, -bound2, bound2)
    return w1, b1, w2, b2


def reference_feed_forward(x, w1, b1, w2, b2):
    """Same bf16-operand / f32-accumulate numerics as the kernel."""
    h = jnp.dot(x.astype(jnp.bfloat16), w1.astype(jnp.bfloat16),
                preferred_element_type=jnp.float32) + b1[None, :]
    h = jnp.maximum(h, 0.0)
    return jnp.dot(h.astype(jnp.bfloat16), w2.astype(jnp.bfloat16),
                   preferred_element_type=jnp.float32) + b2[None, :]


if __name__ == "__main__":
    def run_case(batch, dim, hidden, **ff_kwargs):
        kx, kp = jax.random.split(jax.random.PRNGKey(0))
        x = jax.random.normal(kx, (batch, dim), dtype=jnp.float32)
        w1, b1, w2, b2 = init_feed_forward_params(kp, dim, hidden)
        params = prepare_feed_forward_params(w1, b1, w2, b2)
        out = jax.block_until_ready(feed_forward(x, params, **ff_kwargs))
        ref = reference_feed_forward(x, w1, b1, w2, b2)
        assert out.shape == (batch, dim), out.shape
        outf = out.astype(jnp.float32)
        err = float(jnp.max(jnp.abs(outf - ref)))
        assert jnp.allclose(outf, ref, atol=2e-2, rtol=2e-2), err

    # Aligned shapes: weights fully VMEM-resident, single hidden step.
    run_case(batch=16, dim=128, hidden=256)
    # Unaligned shapes + forced hidden-dim tiling: exercises padding and the
    # accumulator (reduction grid axis) path.
    run_case(batch=12, dim=96, hidden=320, max_tile_h=128)

    print("KERNEL_OK")
</pallas_src>

<mosaic_0001>
module attributes {stable_mosaic.version = 11 : i64} {
  func.func @feed_forward_kernel(%arg0: i32, %arg1: i32, %arg2: memref<16x128xbf16, #tpu.memory_space<vmem>>, %arg3: memref<128x256xbf16, #tpu.memory_space<vmem>>, %arg4: memref<1x256xf32, #tpu.memory_space<vmem>>, %arg5: memref<256x128xbf16, #tpu.memory_space<vmem>>, %arg6: memref<1x128xf32, #tpu.memory_space<vmem>>, %arg7: memref<16x128xbf16, #tpu.memory_space<vmem>>, %arg8: memref<16x128xf32, #tpu.memory_space<vmem>>) attributes {dimension_semantics = [#tpu.dimension_semantics<parallel>, #tpu.dimension_semantics<arbitrary>], iteration_bounds = array<i64: 1, 1>, scalar_prefetch = 0 : i64, scratch_operands = 1 : i64, tpu.core_type = #tpu.core_type<tc>, window_params = [{transform_indices = @transform_0, window_bounds = array<i64: 16, 128>}, {pipeline_mode = #tpu.pipeline_mode<synchronous>, transform_indices = @transform_1, window_bounds = array<i64: 128, 256>}, {pipeline_mode = #tpu.pipeline_mode<synchronous>, transform_indices = @transform_2, window_bounds = array<i64: 1, 256>}, {pipeline_mode = #tpu.pipeline_mode<synchronous>, transform_indices = @transform_3, window_bounds = array<i64: 256, 128>}, {pipeline_mode = #tpu.pipeline_mode<synchronous>, transform_indices = @transform_4, window_bounds = array<i64: 1, 128>}, {transform_indices = @transform_5, window_bounds = array<i64: 16, 128>}]} {
    %c0_i32 = arith.constant 0 : i32
    %0 = arith.cmpi eq, %arg1, %c0_i32 : i32
    %1 = arith.extui %0 : i1 to i32
    %c0_i32_0 = arith.constant 0 : i32
    %2 = arith.cmpi ne, %1, %c0_i32_0 : i32
    scf.if %2 {
      %cst_16 = arith.constant 0.000000e+00 : f32
      %20 = vector.broadcast %cst_16 : f32 to vector<16x128xf32>
      %c0_17 = arith.constant 0 : index
      %c0_18 = arith.constant 0 : index
      %21 = vector.load %arg8[%c0_17, %c0_18] : memref<16x128xf32, #tpu.memory_space<vmem>>, vector<16x128xf32>
      tpu.vector_store %arg8[%c0_17, %c0_18], %20 {strides = array<i32>} : memref<16x128xf32, #tpu.memory_space<vmem>>, vector<16x128xf32>,
    } else {
    }
    %c0 = arith.constant 0 : index
    %c0_1 = arith.constant 0 : index
    %3 = vector.load %arg2[%c0, %c0_1] : memref<16x128xbf16, #tpu.memory_space<vmem>>, vector<16x128xbf16>
    %c0_2 = arith.constant 0 : index
    %c0_3 = arith.constant 0 : index
    %4 = vector.load %arg3[%c0_2, %c0_3] : memref<128x256xbf16, #tpu.memory_space<vmem>>, vector<128x256xbf16>
    %cst = arith.constant dense<0.000000e+00> : vector<16x256xf32>
    %5 = tpu.matmul %3, %4, %cst {dimension_numbers = #tpu.dot_dimension_numbers<[1], [0], [0], [1], [0, 0, 1, 1], [], []>} : vector<16x128xbf16>, vector<128x256xbf16>, vector<16x256xf32> -> vector<16x256xf32>
    %c0_4 = arith.constant 0 : index
    %c0_5 = arith.constant 0 : index
    %6 = vector.load %arg4[%c0_4, %c0_5] : memref<1x256xf32, #tpu.memory_space<vmem>>, vector<1x256xf32>
    %7 = vector.broadcast %6 : vector<1x256xf32> to vector<16x256xf32>
    %8 = arith.addf %5, %7 : vector<16x256xf32>
    %cst_6 = arith.constant 0.000000e+00 : f32
    %9 = vector.broadcast %cst_6 : f32 to vector<16x256xf32>
    %10 = arith.maximumf %8, %9 : vector<16x256xf32>
    %c0_7 = arith.constant 0 : index
    %c0_8 = arith.constant 0 : index
    %11 = vector.load %arg8[%c0_7, %c0_8] : memref<16x128xf32, #tpu.memory_space<vmem>>, vector<16x128xf32>
    %12 = arith.truncf %10 : vector<16x256xf32> to vector<16x256xbf16>
    %c0_9 = arith.constant 0 : index
    %c0_10 = arith.constant 0 : index
    %13 = vector.load %arg5[%c0_9, %c0_10] : memref<256x128xbf16, #tpu.memory_space<vmem>>, vector<256x128xbf16>
    %cst_11 = arith.constant dense<0.000000e+00> : vector<16x128xf32>
    %14 = tpu.matmul %12, %13, %cst_11 {dimension_numbers = #tpu.dot_dimension_numbers<[1], [0], [0], [1], [0, 0, 1, 1], [], []>} : vector<16x256xbf16>, vector<256x128xbf16>, vector<16x128xf32> -> vector<16x128xf32>
    %15 = arith.addf %11, %14 : vector<16x128xf32>
    %c0_12 = arith.constant 0 : index
    %c0_13 = arith.constant 0 : index
    %16 = vector.load %arg8[%c0_12, %c0_13] : memref<16x128xf32, #tpu.memory_space<vmem>>, vector<16x128xf32>
    tpu.vector_store %arg8[%c0_12, %c0_13], %15 {strides = array<i32>} : memref<16x128xf32, #tpu.memory_space<vmem>>, vector<16x128xf32>,
    %c0_i32_14 = arith.constant 0 : i32
    %17 = arith.cmpi eq, %arg1, %c0_i32_14 : i32
    %18 = arith.extui %17 : i1 to i32
    %c0_i32_15 = arith.constant 0 : i32
    %19 = arith.cmpi ne, %18, %c0_i32_15 : i32
    scf.if %19 {
      %c0_16 = arith.constant 0 : index
      %c0_17 = arith.constant 0 : index
      %20 = vector.load %arg8[%c0_16, %c0_17] : memref<16x128xf32, #tpu.memory_space<vmem>>, vector<16x128xf32>
      %c0_18 = arith.constant 0 : index
      %c0_19 = arith.constant 0 : index
      %21 = vector.load %arg6[%c0_18, %c0_19] : memref<1x128xf32, #tpu.memory_space<vmem>>, vector<1x128xf32>
      %22 = vector.broadcast %21 : vector<1x128xf32> to vector<16x128xf32>
      %23 = arith.addf %20, %22 : vector<16x128xf32>
      %24 = arith.truncf %23 : vector<16x128xf32> to vector<16x128xbf16>
      %c0_20 = arith.constant 0 : index
      %c0_21 = arith.constant 0 : index
      %25 = vector.load %arg7[%c0_20, %c0_21] : memref<16x128xbf16, #tpu.memory_space<vmem>>, vector<16x128xbf16>
      tpu.vector_store %arg7[%c0_20, %c0_21], %24 {strides = array<i32>} : memref<16x128xbf16, #tpu.memory_space<vmem>>, vector<16x128xbf16>,
    } else {
    }
    return
  }
  func.func @transform_0(%arg0: i32, %arg1: i32) -> (i32, i32) {
    %c0_i32 = arith.constant 0 : i32
    %c0_i32_0 = arith.constant 0 : i32
    return %arg0, %c0_i32 : i32, i32
  }
  func.func @transform_1(%arg0: i32, %arg1: i32) -> (i32, i32) {
    %c0_i32 = arith.constant 0 : i32
    %c0_i32_0 = arith.constant 0 : i32
    return %c0_i32, %arg1 : i32, i32
  }
  func.func @transform_2(%arg0: i32, %arg1: i32) -> (i32, i32) {
    %c0_i32 = arith.constant 0 : i32
    %c0_i32_0 = arith.constant 0 : i32
    return %c0_i32, %arg1 : i32, i32
  }
  func.func @transform_3(%arg0: i32, %arg1: i32) -> (i32, i32) {
    %c0_i32 = arith.constant 0 : i32
    %c0_i32_0 = arith.constant 0 : i32
    return %arg1, %c0_i32 : i32, i32
  }
  func.func @transform_4(%arg0: i32, %arg1: i32) -> (i32, i32) {
    %c0_i32 = arith.constant 0 : i32
    %c0_i32_0 = arith.constant 0 : i32
    %c0_i32_1 = arith.constant 0 : i32
    return %c0_i32, %c0_i32_0 : i32, i32
  }
  func.func @transform_5(%arg0: i32, %arg1: i32) -> (i32, i32) {
    %c0_i32 = arith.constant 0 : i32
    %c0_i32_0 = arith.constant 0 : i32
    return %arg0, %c0_i32 : i32, i32
  }
}

</mosaic_0001>

<bundles_post_ra>
// kernel: tpu_custom_call.1
= control target key start
LH: loop header
LB: loop body
LE: loop exit
PB: predicated region body
PF: predicated region fallthrough
CT: control target
= control target key end

     0   :  { %10 = vsyncpa [#allocation4], 0  ;;  %s762_s0 = inlined_call_operand.hbm [shape: bf16[16,128], index: 0, kind: input, shape index: {}]   ;;  %s763_s1 = inlined_call_operand.hbm [shape: bf16[128,256], index: 1, kind: input, shape index: {}]   ;;  %s764_s2 = inlined_call_operand.vmem [shape: f32[1,256], index: 2, kind: input, shape index: {}]   ;;  %s765_s3 = inlined_call_operand.hbm [shape: bf16[256,128], index: 3, kind: input, shape index: {}]   ;;  %s766_s4 = inlined_call_operand.vmem [shape: f32[1,128], index: 4, kind: input, shape index: {}]   ;;  %s767_s5 = inlined_call_operand.hbm [shape: bf16[16,128], index: 5, kind: output, shape index: {}]  }
   0x1   :  { %11 = vsyncpa [#allocation7], 0 }
   0x2   :  { %12 = vsyncpa [#allocation5], 0  ;;  %s660_s18 = smov [#allocation6]   ;;  %s566_s22 = scalar_lea.hbm %s763_s1, 2048 }
   0x3   :  { %s30_s19 = sshll.u32 %s660_s18, 4  ;;  %p567_p0 = scmp.ne.s32.totalorder %s763_s1, %s566_s22  ;;  %s31_s19 = int_to_ptr.vmem [resolvable:$true] %s30_s19 }
   0x4   :  { %p570_p1 = scmp.lt.u32.totalorder %s566_s22, %s763_s1 }
   0x6   :  { %p572_p2 = pnand %p570_p1, %p567_p0 }
   0x8   :  { %575 = shalt.err (!%p572_p2)
}
   0x9   :  { %s576_s27 = scalar_lea.vmem %s31_s19, 2048  ;;  %p581_p4 = scmp.lt.s32.totalorder %s31_s19, %s31_s19 }
   0xa   :  { %p577_p3 = scmp.ne.s32.totalorder %s31_s19, %s576_s27  ;;  %p582_p5 = scmp.lt.s32.totalorder %s576_s27, %s576_s27 }
   0xc   :  { %p583_p6 = por %p582_p5, %p581_p4 }
   0xe   :  { %p584_p7 = pnand %p583_p6, %p577_p3 }
  0x10   :  { %587 = shalt.err (!%p584_p7)
}
  0x11   :  { %s661_s28 = smov 128   ;;  %s662_s29 = smov 8  }
  0x12   :  { %36 = dma.hbm_to_vmem [thread:$0]  %s763_s1, 2048, %s31_s19, [#allocation7], %s661_s28, %s661_s28, %s662_s29  }
  0x13   :  { %s663_s7 = smov [#allocation3]   ;;  %s588_s11 = scalar_lea.hbm %s762_s0, 128 }
  0x14   :  { %s18_s8 = sshll.u32 %s663_s7, 4  ;;  %p589_p8 = scmp.ne.s32.totalorder %s762_s0, %s588_s11  ;;  %s19_s8 = int_to_ptr.vmem [resolvable:$true] %s18_s8 }
  0x15   :  { %p592_p9 = scmp.lt.u32.totalorder %s588_s11, %s762_s0 }
  0x17   :  { %p594_p10 = pnand %p592_p9, %p589_p8 }
  0x19   :  { %597 = shalt.err (!%p594_p10)
}
  0x1a   :  { %s598_s16 = scalar_lea.vmem %s19_s8, 128  ;;  %p603_p12 = scmp.lt.s32.totalorder %s19_s8, %s19_s8 }
  0x1b   :  { %p599_p11 = scmp.ne.s32.totalorder %s19_s8, %s598_s16  ;;  %p604_p13 = scmp.lt.s32.totalorder %s598_s16, %s598_s16 }
  0x1d   :  { %p605_p0 = por %p604_p13, %p603_p12 }
  0x1f   :  { %p606_p1 = pnand %p605_p0, %p599_p11 }
  0x21   :  { %609 = shalt.err (!%p606_p1)
}
  0x22   :  { %s664_s1 = smov 64   ;;  %s665_s17 = smov 4  }
  0x23   :  { %24 = dma.hbm_to_vmem [thread:$0]  %s762_s0, 128, %s19_s8, [#allocation4], %s664_s1, %s664_s1, %s665_s17  }
  0x24   :  { %s666_s20 = smov [#allocation8]   ;;  %s610_s24 = scalar_lea.hbm %s765_s3, 2048 }
  0x25   :  { %s44_s21 = sshll.u32 %s666_s20, 4  ;;  %p611_p2 = scmp.ne.s32.totalorder %s765_s3, %s610_s24  ;;  %s45_s21 = int_to_ptr.vmem [resolvable:$true] %s44_s21 }
  0x26   :  { %p614_p3 = scmp.lt.u32.totalorder %s610_s24, %s765_s3 }
  0x28   :  { %p616_p4 = pnand %p614_p3, %p611_p2 }
  0x2a   :  { %619 = shalt.err (!%p616_p4)
}
  0x2b   :  { %s620_s29 = scalar_lea.vmem %s45_s21, 2048  ;;  %p625_p6 = scmp.lt.s32.totalorder %s45_s21, %s45_s21 }
  0x2c   :  { %p621_p5 = scmp.ne.s32.totalorder %s45_s21, %s620_s29  ;;  %p626_p7 = scmp.lt.s32.totalorder %s620_s29, %s620_s29 }
  0x2e   :  { %p627_p8 = por %p626_p7, %p625_p6 }
  0x30   :  { %p628_p9 = pnand %p627_p8, %p621_p5 }
  0x32   :  { %631 = shalt.err (!%p628_p9)
}
  0x33   :  { %50 = dma.hbm_to_vmem [thread:$0]  %s765_s3, 2048, %s45_s21, [#allocation7], %s664_s1, %s664_s1, %s665_s17  }
  0x34   :  { %654 = dma.done.wait [#allocation4], 128  }
  0x35   :  { %655 = vsyncadd [#allocation4], 4294967168 }
  0x36   :  { %656 = dma.done.wait [#allocation7], 4096  }
  0x37   :  { %657 = vsyncadd [#allocation7], 4294963200  ;;  %v667_v0 = vmov 0   ;;  %v525_v1 = vld [vmem:[#allocation6 + $0x4] ss:$8 sps:$4 sm:$0xff]   ;;  %v554_v16 = vld [vmem:[#allocation8 + $0x50] sm:$0xff]   ;;  %v89_v34 = vlaneseq }
  0x38   :  { %217 = vmatprep.mubr.bf16.mxu0 %v667_v0  ;;  %v527_v2 = vld [vmem:[#allocation6] ss:$8 sps:$4 sm:$0xff]   ;;  %185 = vmatprep.subr.bf16.mxu0 %v525_v1  ;;  %v528_v3 = vld [vmem:[#allocation6 + $0x14] ss:$8 sps:$4 sm:$0xff]   ;;  %v530_v4 = vld [vmem:[#allocation6 + $0x10] ss:$8 sps:$4 sm:$0xff]  }
  0x39   :  { %186 = vmatpush1.bf16.msra.mxu0 %v527_v2  ;;  %v531_v5 = vld [vmem:[#allocation6 + $0x24] ss:$8 sps:$4 sm:$0xff]   ;;  %v533_v6 = vld [vmem:[#allocation6 + $0x20] ss:$8 sps:$4 sm:$0xff]   ;;  %v534_v7 = vld [vmem:[#allocation6 + $0x34] ss:$8 sps:$4 sm:$0xff]  }
  0x3a   :  { %187 = vmatprep.subr.bf16.mxu0 %v528_v3  ;;  %v536_v8 = vld [vmem:[#allocation6 + $0x30] ss:$8 sps:$4 sm:$0xff]   ;;  %v537_v9 = vld [vmem:[#allocation6 + $0x44] ss:$8 sps:$4 sm:$0xff]   ;;  %v539_v11 = vld [vmem:[#allocation6 + $0x40] ss:$8 sps:$4 sm:$0xff]  }
  0x3b   :  { %v550_v10 = vld [vmem:[#allocation8 + $0x40] sm:$0xff]   ;;  %v540_v13 = vld [vmem:[#allocation6 + $0x54] ss:$8 sps:$4 sm:$0xff]   ;;  %v552_v14 = vld [vmem:[#allocation8 + $0x48] sm:$0xff]   ;;  %v90_v35 = vshrl.u32 %v89_v34, 7  ;;  %s668_s8 = smov [#allocation9]  }
  0x3c   :  { %v551_v12 = vld [vmem:[#allocation8] sm:$0xff]   ;;  %494 = vmatprep.subr.bf16.mxu1 %v550_v10  ;;  %v553_v15 = vld [vmem:[#allocation8 + $0x8] sm:$0xff]   ;;  %v542_v17 = vld [vmem:[#allocation6 + $0x50] ss:$8 sps:$4 sm:$0xff]   ;;  %s438_s9 = sshll.u32 %s668_s8, 4  ;;  %s439_s9 = int_to_ptr.vmem [resolvable:$true] %s438_s9 }
  0x3d   :  { %188 = vmatpush1.bf16.msra.mxu0 %v530_v4  ;;  %495 = vmatpush3.bf16.msra.mxu1 %v551_v12  ;;  %v543_v18 = vld [vmem:[#allocation6 + $0x64] ss:$8 sps:$4 sm:$0xff]   ;;  %v555_v19 = vld [vmem:[#allocation8 + $0x10] sm:$0xff]   ;;  %v556_v20 = vld [vmem:[#allocation8 + $0x58] sm:$0xff]   ;;  %v91_v36 = vsub.s32 0, %v90_v35  ;;  %v95_v38 = vsub.s32 1, %v90_v35  ;;  %p637_p11 = scmp.lt.s32.totalorder %s439_s9, %s439_s9 }
  0x3e   :  { %189 = vmatprep.subr.bf16.mxu0 %v531_v5  ;;  %496 = vmatprep.subr.bf16.mxu1 %v552_v14  ;;  %v545_v21 = vld [vmem:[#allocation6 + $0x60] ss:$8 sps:$4 sm:$0xff]   ;;  %v546_v22 = vld [vmem:[#allocation6 + $0x74] ss:$8 sps:$4 sm:$0xff]   ;;  %v548_v25 = vld [vmem:[#allocation6 + $0x70] ss:$8 sps:$4 sm:$0xff]  }
  0x3f   :  { %v557_v23 = vld [vmem:[#allocation8 + $0x18] sm:$0xff]   ;;  %v558_v24 = vld [vmem:[#allocation8 + $0x60] sm:$0xff]   ;;  %v560_v27 = vld [vmem:[#allocation8 + $0x68] sm:$0xff]   ;;  %s632_s10 = scalar_lea.vmem %s439_s9, 128 }
  0x40   :  { %v559_v26 = vld [vmem:[#allocation8 + $0x20] sm:$0xff]   ;;  %v549_v28 = vld [vmem:[#allocation3] sm:$0xff]   ;;  %v561_v29 = vld [vmem:[#allocation8 + $0x28] sm:$0xff]   ;;  %p633_p10 = scmp.ne.s32.totalorder %s439_s9, %s632_s10  ;;  %p638_p12 = scmp.lt.s32.totalorder %s632_s10, %s632_s10 }
  0x41   :  { %190 = vmatpush1.bf16.msra.mxu0 %v533_v6  ;;  %497 = vmatpush3.bf16.msra.mxu1 %v553_v15  ;;  %v562_v30 = vld [vmem:[#allocation8 + $0x70] sm:$0xff]   ;;  %v564_v32 = vld [vmem:[#allocation8 + $0x78] sm:$0xff]  }
  0x42   :  { %191 = vmatprep.subr.bf16.mxu0 %v534_v7  ;;  %498 = vmatprep.subr.bf16.mxu1 %v554_v16  ;;  %v563_v31 = vld [vmem:[#allocation8 + $0x30] sm:$0xff]   ;;  %v565_v33 = vld [vmem:[#allocation8 + $0x38] sm:$0xff]   ;;  %p639_p13 = por %p638_p12, %p637_p11 }
  0x43   :  { %v87_v37 = vld [vmem:[%s764_s2] sm:$0x3] }
  0x44   :  { %v92_v39 = vrot.slane %v87_v37, %v91_v36  ;;  %v96_v40 = vrot.slane %v87_v37, %v95_v38  ;;  %v484_v59 = vld [vmem:[%s766_s4] ss:$0 sm:$0xff]  ;;  %p640_p0 = pnand %p639_p13, %p633_p10 }
  0x45   :  { %192 = vmatpush1.bf16.msra.mxu0 %v536_v8  ;;  %499 = vmatpush3.bf16.msra.mxu1 %v555_v19 }
  0x46   :  { %193 = vmatprep.subr.bf16.mxu0 %v537_v9  ;;  %500 = vmatprep.subr.bf16.mxu1 %v556_v20 }
  0x49   :  { %194 = vmatpush1.bf16.msra.mxu0 %v539_v11  ;;  %501 = vmatpush3.bf16.msra.mxu1 %v557_v23 }
  0x4a   :  { %195 = vmatprep.subr.bf16.mxu0 %v540_v13  ;;  %502 = vmatprep.subr.bf16.mxu1 %v558_v24 }
  0x4d   :  { %196 = vmatpush1.bf16.msra.mxu0 %v542_v17  ;;  %503 = vmatpush3.bf16.msra.mxu1 %v559_v26 }
  0x4e   :  { %197 = vmatprep.subr.bf16.mxu0 %v543_v18  ;;  %504 = vmatprep.subr.bf16.mxu1 %v560_v27 }
  0x51   :  { %198 = vmatpush1.bf16.msra.mxu0 %v545_v21  ;;  %505 = vmatpush3.bf16.msra.mxu1 %v561_v29 }
  0x52   :  { %199 = vmatprep.subr.bf16.mxu0 %v546_v22  ;;  %506 = vmatprep.subr.bf16.mxu1 %v562_v30 }
  0x55   :  { %200 = vmatpush1.bf16.msra.mxu0 %v548_v25  ;;  %507 = vmatpush3.bf16.msra.mxu1 %v563_v31 }
  0x56   :  { %508 = vmatprep.subr.bf16.mxu1 %v564_v32 }
  0x58   :  { %218 = vmatmul.mubr.bf16.vlgmr.msra.gmra.mrb[0].mxu0 %v549_v28 }
  0x59   :  { %509 = vmatpush3.bf16.msra.mxu1 %v565_v33 }
 0x12b   :  { %v219_v41 = vpop.f32.mrb[0].mxu0 }
 0x12c   :  { %v220_v42 = vadd.f32 %v219_v41, %v92_v39  ;;  %v221_v43 = vpop.f32.mrb[1].mxu0 }
 0x12d   :  { %v222_v44 = vadd.f32 %v221_v43, %v96_v40  ;;  %v223_v45 = vpop.f32.mrb[2].mxu0 }
 0x12e   :  { %v224_v46 = vadd.f32 %v223_v45, %v92_v39  ;;  %v225_v47 = vpop.f32.mrb[3].mxu0  ;;  %v228_v49 = vmax.f32 %v220_v42, 0.0 }
 0x12f   :  { %v226_v48 = vadd.f32 %v225_v47, %v96_v40  ;;  %v229_v51 = vmax.f32 %v222_v44, 0.0 }
 0x130   :  { %v230_v50 = vmax.f32 %v224_v46, 0.0 }
 0x131   :  { %v231_v52 = vmax.f32 %v226_v48, 0.0 }
 0x132   :  { %v234_v53 = vpack.c.bf16 %v230_v50, %v228_v49 }
 0x133   :  { %v235_v54 = vpack.c.bf16 %v231_v52, %v229_v51 }
 0x135   :  { %396 = vmatprep.mubr.bf16.mxu1 %v235_v54 }
 0x136   :  { %397 = vmatmul.mubr.bf16.vlgmr.msra.gmra.mrb[0].mxu1 %v234_v53 }
 0x209   :  { %v510_v55 = vpop.f32.mrb[0].mxu1 }
 0x20a   :  { %v511_v56 = vpop.f32.mrb[1].mxu1 }
 0x20b   :  { %v512_v57 = vadd.f32 %v511_v56, %v510_v55  ;;  %v513_v58 = vpop.f32.mrb[2].mxu1 }
 0x20c   :  { %v514_v60 = vpop.f32.mrb[3].mxu1 }
 0x20d   :  { %v515_v61 = vadd.f32 %v514_v60, %v513_v58  ;;  %v421_v62 = vadd.f32 %v512_v57, %v484_v59 }
 0x20f   :  { %v422_v63 = vadd.f32 %v515_v61, %v484_v59 }
 0x211   :  { %v492_v0 = vpack.c.bf16 %v422_v63, %v421_v62 }
 0x213   :  { %493 = vst [vmem:[#allocation9] sm:$0xff] %v492_v0  }
 0x214   :  { %643 = shalt.err (!%p640_p0)
}
 0x215   :  { %s644_s4 = scalar_lea.hbm %s767_s5, 128 }
 0x216   :  { %p645_p1 = scmp.ne.s32.totalorder %s767_s5, %s644_s4  ;;  %p648_p2 = scmp.lt.u32.totalorder %s644_s4, %s767_s5 }
 0x218   :  { %p650_p3 = pnand %p648_p2, %p645_p1 }
 0x21a   :  { %653 = shalt.err (!%p650_p3)
}
 0x21b   :  { %444 = dma.vmem_to_hbm [thread:$0]  %s439_s9, 128, %s767_s5, [#allocation5], %s664_s1, %s664_s1, %s665_s17  }
 0x21c   :  { %658 = dma.done.wait [#allocation5], 128  }
 0x21d   :  { %659 = vsyncadd [#allocation5], 4294967168 }
 0x21e   :  { %448 = vsyncpa [#allocation4], 1 }
 0x21f   :  { %449 = vsyncpa [#allocation7], 1 }
 0x220   :  { %450 = vsyncpa [#allocation5], 1 }

</bundles_post_ra>
